<compile_context>
chip_gen: v7x
topology: tpu7x:2x2x1
jax: 0.10.0
libtpu: 0.0.40
codegen_flags: <defaults>
</compile_context>

<pallas_src>
import math
import functools

import jax
import jax.numpy as jnp
from jax.scipy.special import gammaln
from jax.experimental import pallas as pl
from jax.experimental.pallas import tpu as pltpu

_LOG_2PI = math.log(2.0 * math.pi)
_LANES = 128
_GROUPS = ("qw1", "qw0", "qz2", "qz1")
_CONC = 0.1          # Gamma concentration is identical for every latent group


def _round_up(n, m):
    return ((n + m - 1) // m) * m


def _scale_from_log(log_scale):
    # stable softplus + clamp (torch clamps scale at 1e-5)
    return jnp.maximum(jax.nn.softplus(log_scale), 1e-5)


# ---------------------------------------------------------------------------
# Kernel 1: Gamma log-prior core + LogNormal entropy core over the packed slab.
#   grid = (row_tiles, S); constants (r, loc, hinv) are indexed only by the row
#   tile -> fetched once per row tile, resident across the S axis.
#   Accumulate elementwise into VMEM vreg accumulators; reduce once at the end.
# ---------------------------------------------------------------------------
def _prior_entropy_kernel(x_ref, r_ref, loc_ref, hinv_ref, out_ref,
                          acc_lp, acc_ent):
    ri = pl.program_id(0)
    si = pl.program_id(1)

    @pl.when(jnp.logical_and(ri == 0, si == 0))
    def _():
        acc_lp[...] = jnp.zeros_like(acc_lp)
        acc_ent[...] = jnp.zeros_like(acc_ent)

    x = x_ref[0]                                  # [TILE_R, 128]
    logx = jnp.log(x)                             # EUP
    # Gamma log-prob core: (c-1)*log x - r*x     ((c-1) identical for all groups)
    acc_lp[...] += (_CONC - 1.0) * logx - r_ref[...] * x
    # -LogNormal log-prob core: 0.5*((log x - loc)/scale)^2 + log x
    zh = (logx - loc_ref[...]) * hinv_ref[...]    # hinv = 1/(scale*sqrt(2))
    acc_ent[...] += zh * zh + logx

    @pl.when(jnp.logical_and(ri == pl.num_programs(0) - 1,
                             si == pl.num_programs(1) - 1))
    def _():
        out_ref[0] = jnp.sum(acc_lp[...])
        out_ref[1] = jnp.sum(acc_ent[...])


def _prior_entropy_sums(x_packed, r_vec, loc_vec, hinv_vec, tile_r):
    S, rows, _ = x_packed.shape
    rt = rows // tile_r
    return pl.pallas_call(
        _prior_entropy_kernel,
        out_shape=jax.ShapeDtypeStruct((2,), jnp.float32),
        grid_spec=pltpu.PrefetchScalarGridSpec(
            num_scalar_prefetch=0,
            # row tile OUTER, sample INNER: constant blocks keep the same index
            # across the inner axis -> no re-DMA, VMEM-resident.
            grid=(rt, S),
            in_specs=[
                pl.BlockSpec((1, tile_r, _LANES), lambda r, s: (s, r, 0)),
                pl.BlockSpec((tile_r, _LANES), lambda r, s: (r, 0)),
                pl.BlockSpec((tile_r, _LANES), lambda r, s: (r, 0)),
                pl.BlockSpec((tile_r, _LANES), lambda r, s: (r, 0)),
            ],
            out_specs=pl.BlockSpec(memory_space=pltpu.MemorySpace.SMEM),
            scratch_shapes=[pltpu.VMEM((tile_r, _LANES), jnp.float32),
                            pltpu.VMEM((tile_r, _LANES), jnp.float32)]),
        compiler_params=pltpu.CompilerParams(
            dimension_semantics=("arbitrary", "arbitrary"),
            vmem_limit_bytes=48 * 1024 * 1024),
    )(x_packed, r_vec, loc_vec, hinv_vec)


# ---------------------------------------------------------------------------
# Kernel 2: masked Poisson data log-likelihood, tiled over D.
#   Per tile: unrolled S-loop of [B,L]x[L,TILE_D] MXU matmuls accumulating
#   sum_s(rate) and prod_s(rate); one log per (b,d) element (EUP saver).
#   z1_sel stays VMEM-resident across all D tiles (constant block index).
# ---------------------------------------------------------------------------
def _data_ll_kernel(z1_ref, w0_ref, ck_ref, keep_ref, out_ref):
    d = pl.program_id(0)

    @pl.when(d == 0)
    def _():
        out_ref[0] = jnp.float32(0.0)

    ns = z1_ref.shape[0]
    rate = jnp.dot(z1_ref[0], w0_ref[0], preferred_element_type=jnp.float32)
    prod = rate
    ssum = rate
    for s in range(1, ns):                 # small static S -> unrolled
        rate = jnp.dot(z1_ref[s], w0_ref[s], preferred_element_type=jnp.float32)
        prod = prod * rate
        ssum = ssum + rate
    # One log per element instead of S; clip guards masked / D-padded entries
    # (there ck == keep == 0, so they contribute nothing).
    # TODO(synk): for large S, renormalize the running product (pairwise logs)
    # to avoid f32 overflow/underflow of prod.
    log_prod = jnp.log(jnp.clip(prod, 1e-30, 1e30))
    out_ref[0] += jnp.sum(ck_ref[...] * log_prod - keep_ref[...] * ssum)


def _data_ll_sum(z1_sel, w0_p, ck_p, keep_p, tile_d):
    S, B, L = z1_sel.shape
    d_pad = w0_p.shape[2]
    dt = d_pad // tile_d
    return pl.pallas_call(
        _data_ll_kernel,
        out_shape=jax.ShapeDtypeStruct((1,), jnp.float32),
        grid_spec=pltpu.PrefetchScalarGridSpec(
            num_scalar_prefetch=0,
            grid=(dt,),
            in_specs=[
                pl.BlockSpec((S, B, L), lambda d: (0, 0, 0)),       # resident
                pl.BlockSpec((S, L, tile_d), lambda d: (0, 0, d)),
                pl.BlockSpec((B, tile_d), lambda d: (0, d)),
                pl.BlockSpec((B, tile_d), lambda d: (0, d)),
            ],
            out_specs=pl.BlockSpec(memory_space=pltpu.MemorySpace.SMEM)),
        compiler_params=pltpu.CompilerParams(
            dimension_semantics=("arbitrary",),
            vmem_limit_bytes=48 * 1024 * 1024),
    )(z1_sel, w0_p, ck_p, keep_p)


# ---------------------------------------------------------------------------
# Jitted forward: sampling + packing + both kernels + scalar constants.
# ---------------------------------------------------------------------------
@functools.partial(jax.jit, static_argnums=(0, 1, 2))
def _forward_impl(priors_t, num_datapoints, num_samples,
                  params, key, idx, counts, mask):
    priors = dict(priors_t)
    S = num_samples

    # ---- reparameterized LogNormal samples (fused by XLA with the packing) ----
    samples = {}
    scales = {}
    keys = jax.random.split(key, len(_GROUPS))
    for k, name in zip(keys, _GROUPS):
        loc = params[name]["location"]
        scale = _scale_from_log(params[name]["log_scale"])
        eps = jax.random.normal(k, (S,) + loc.shape, jnp.float32)
        samples[name] = jnp.exp(loc + scale * eps)
        scales[name] = scale

    # ---- lane-dense packing: samples [S, ROWS, 128]; constants once [ROWS, 128] ----
    xs, rs, locs, hinvs = [], [], [], []
    lp_const = 0.0            # per-sample Gamma normalizer: sum c*log r - lgamma(c)
    total = 0
    for name in _GROUPS:
        conc, rate = priors[name]
        loc = params[name]["location"].astype(jnp.float32).reshape(-1)
        scale = scales[name].astype(jnp.float32).reshape(-1)
        n = loc.shape[0]
        total += n
        xs.append(samples[name].reshape(S, n))
        rs.append(jnp.full((n,), rate, jnp.float32))
        locs.append(loc)
        hinvs.append(math.sqrt(0.5) / scale)
        lp_const += n * (conc * math.log(rate) - math.lgamma(conc))

    raw_rows = -(-total // _LANES)
    tile_r = min(256, _round_up(raw_rows, 8))
    rows = _round_up(raw_rows, tile_r)
    pad = rows * _LANES - total

    x = jnp.concatenate(xs, axis=1)
    x = jnp.pad(x, ((0, 0), (0, pad)), constant_values=1.0)     # log(1)=0 -> pad adds 0
    x_packed = x.reshape(S, rows, _LANES)

    def pack_const(parts):
        return jnp.pad(jnp.concatenate(parts), (0, pad)).reshape(rows, _LANES)

    r_vec = pack_const(rs)
    loc_vec = pack_const(locs)
    hinv_vec = pack_const(hinvs)

    pe = _prior_entropy_sums(x_packed, r_vec, loc_vec, hinv_vec, tile_r)
    log_scale_sum = sum(jnp.sum(jnp.log(scales[name])) for name in _GROUPS)
    log_prior = pe[0] / S + lp_const
    entropy = pe[1] / S + log_scale_sum + total * (0.5 * _LOG_2PI)

    # ---- masked Poisson data log-likelihood ----
    counts = counts.astype(jnp.float32)
    keep = (1.0 - mask).astype(jnp.float32)
    ck = counts * keep
    lgc_keep = jnp.sum(keep * gammaln(counts + 1.0))   # sample-invariant, hoisted

    # TODO(synk): the qz1 row gather could move in-kernel via scalar-prefetched
    # indices; kept as an XLA gather since [S,B,L0] is small next to the D-tiled work.
    z1_sel = jnp.take(samples["qz1"], idx, axis=1)     # [S, B, L0]
    w0 = samples["qw0"]                                # [S, L0, D]

    B, D = counts.shape
    d_pad = _round_up(D, _LANES)
    n128 = d_pad // _LANES
    units = 1
    for u in (4, 3, 2, 1):                 # biggest <=512-lane tile dividing d_pad
        if n128 % u == 0:
            units = u
            break
    tile_d = units * _LANES
    pad_d = d_pad - D
    w0_p = jnp.pad(w0, ((0, 0), (0, 0), (0, pad_d)))
    ck_p = jnp.pad(ck, ((0, 0), (0, pad_d)))
    keep_p = jnp.pad(keep, ((0, 0), (0, pad_d)))

    ll_sum = _data_ll_sum(z1_sel, w0_p, ck_p, keep_p, tile_d)[0]
    # torch: sum over batch -> [S, D]; * N/B; mean over (S, D)
    data_ll = (num_datapoints / B) * (ll_sum / (S * D) - lgc_keep / D)

    elbo = data_ll + log_prior + entropy
    return elbo, log_prior, entropy, data_ll, samples


# ---------------------------------------------------------------------------
# DEF model wrapper (parameter setup; forward is fully jitted).
# ---------------------------------------------------------------------------
class DEFPallas:
    def __init__(self, num_datapoints, data_dim, layer_dim, num_samples, seed=0):
        self.num_datapoints = num_datapoints
        self.data_dim = data_dim
        self.layer_dim = layer_dim
        self.num_samples = num_samples

        key = jax.random.PRNGKey(seed)
        shapes = {
            "qw1": (layer_dim[1], layer_dim[0]),
            "qw0": (layer_dim[0], data_dim),
            "qz2": (num_datapoints, layer_dim[1]),
            "qz1": (num_datapoints, layer_dim[0]),
        }
        self.params = {}
        for name, shape in shapes.items():
            key, k_loc, k_ls = jax.random.split(key, 3)
            bound = math.sqrt(6.0 / (shape[0] + shape[1]))   # xavier_uniform
            self.params[name] = dict(
                location=jax.random.uniform(k_loc, shape, jnp.float32, -bound, bound),
                log_scale=jax.random.uniform(k_ls, shape, jnp.float32, -bound, bound),
            )
        # Gamma priors: concentration=0.1; rate=0.3 except z1, whose rate is
        # 0.3 / (E[Gamma(0.1,0.3)]^2) = 2.7
        gmean = 0.1 / 0.3
        self.priors = {"qw1": (0.1, 0.3), "qw0": (0.1, 0.3),
                       "qz2": (0.1, 0.3), "qz1": (0.1, 0.3 / (gmean * gmean))}
        self._priors_t = tuple((name, self.priors[name]) for name in _GROUPS)

    def _scale(self, log_scale):
        return _scale_from_log(log_scale)

    def forward(self, datapoints_indices, data, holdout_mask, key):
        elbo, log_prior, entropy, data_ll, samples = _forward_impl(
            self._priors_t, self.num_datapoints, self.num_samples,
            self.params, key, datapoints_indices, data, holdout_mask)
        # TODO(synk): SummaryWriter Tensorboard logging has no Pallas equivalent.
        return elbo, (log_prior, entropy, data_ll), samples


# ---------------------------------------------------------------------------
# Pure-JAX reference (for correctness checking only).
# ---------------------------------------------------------------------------
def ref_elbo(model, samples, idx, data, mask):
    def gamma_lp(x, c, r):
        return c * jnp.log(r) - gammaln(c) + (c - 1.0) * jnp.log(x) - r * x

    def lognormal_lp(x, loc, scale):
        logx = jnp.log(x)
        return (-0.5 * ((logx - loc) / scale) ** 2
                - logx - jnp.log(scale) - 0.5 * _LOG_2PI)

    lp = 0.0
    ent = 0.0
    for name in _GROUPS:
        c, r = model.priors[name]
        p = model.params[name]
        sc = model._scale(p["log_scale"])
        x = samples[name]
        lp = lp + jnp.sum(gamma_lp(x, c, r), axis=(1, 2))
        ent = ent - jnp.sum(lognormal_lp(x, p["location"], sc), axis=(1, 2))
    log_prior = jnp.mean(lp)
    entropy = jnp.mean(ent)

    z1_sel = samples["qz1"][:, idx, :]
    rate = jnp.einsum("sbl,sld->sbd", z1_sel, samples["qw0"],
                      precision=jax.lax.Precision.HIGHEST)
    ll = data * jnp.log(rate) - rate - gammaln(data + 1.0)
    ll = jnp.sum(ll * (1.0 - mask), axis=1)              # [S, D]
    dll = jnp.mean(ll * (model.num_datapoints / data.shape[0]))
    return dll + log_prior + entropy


if __name__ == "__main__":
    N, D = 16, 32                 # num_datapoints, data_dim
    layer_dim = [8, 4]            # [L0, L1]
    S, B = 4, 8                   # num_samples, batch_size

    model = DEFPallas(N, D, layer_dim, S, seed=0)

    key = jax.random.PRNGKey(0)
    k_idx, k_data, k_mask, k_sample = jax.random.split(key, 4)
    datapoints_indices = jax.random.randint(k_idx, (B,), 0, N)
    counts = jax.random.poisson(k_data, 3.0, (B, D)).astype(jnp.float32)
    holdout_mask = (jax.random.uniform(k_mask, (B, D)) < 0.2).astype(jnp.float32)

    elbo, (log_prior, entropy, data_ll), samples = model.forward(
        datapoints_indices, counts, holdout_mask, k_sample)
    elbo = jax.block_until_ready(elbo)

    ref = ref_elbo(model, samples, datapoints_indices, counts, holdout_mask)
    assert jnp.allclose(elbo, ref, rtol=2e-3, atol=5e-2), (float(elbo), float(ref))

    print("KERNEL_OK")
</pallas_src>

<mosaic_0001>
module attributes {stable_mosaic.version = 11 : i64} {
  func.func @_data_ll_kernel(%arg0: i32, %arg1: memref<4x8x8xf32, #tpu.memory_space<vmem>>, %arg2: memref<4x8x128xf32, #tpu.memory_space<vmem>>, %arg3: memref<8x128xf32, #tpu.memory_space<vmem>>, %arg4: memref<8x128xf32, #tpu.memory_space<vmem>>, %arg5: memref<1xf32, #tpu.memory_space<smem>>) attributes {dimension_semantics = [#tpu.dimension_semantics<arbitrary>], iteration_bounds = array<i64: 1>, scalar_prefetch = 0 : i64, scratch_operands = 0 : i64, tpu.core_type = #tpu.core_type<tc>, window_params = [{pipeline_mode = #tpu.pipeline_mode<synchronous>, transform_indices = @transform_0, window_bounds = array<i64: 4, 8, 8>}, {transform_indices = @transform_1, window_bounds = array<i64: 4, 8, 128>}, {transform_indices = @transform_2, window_bounds = array<i64: 8, 128>}, {transform_indices = @transform_3, window_bounds = array<i64: 8, 128>}, {transform_indices = @transform_4, window_bounds = array<i64: 1>}]} {
    %c0_i32 = arith.constant 0 : i32
    %0 = arith.cmpi eq, %arg0, %c0_i32 : i32
    %1 = arith.extui %0 : i1 to i32
    %c0_i32_0 = arith.constant 0 : i32
    %2 = arith.cmpi ne, %1, %c0_i32_0 : i32
    scf.if %2 {
      %cst_33 = arith.constant 0.000000e+00 : f32
      %c0_34 = arith.constant 0 : index
      %46 = memref.load %arg5[%c0_34] : memref<1xf32, #tpu.memory_space<smem>>
      memref.store %cst_33, %arg5[%c0_34] : memref<1xf32, #tpu.memory_space<smem>>
    } else {
    }
    %c0 = arith.constant 0 : index
    %c0_1 = arith.constant 0 : index
    %c0_2 = arith.constant 0 : index
    %3 = vector.load %arg1[%c0, %c0_1, %c0_2] : memref<4x8x8xf32, #tpu.memory_space<vmem>>, vector<1x8x8xf32>
    %4 = vector.shape_cast %3 : vector<1x8x8xf32> to vector<8x8xf32>
    %c0_3 = arith.constant 0 : index
    %c0_4 = arith.constant 0 : index
    %c0_5 = arith.constant 0 : index
    %5 = vector.load %arg2[%c0_3, %c0_4, %c0_5] : memref<4x8x128xf32, #tpu.memory_space<vmem>>, vector<1x8x128xf32>
    %6 = vector.shape_cast %5 : vector<1x8x128xf32> to vector<8x128xf32>
    %cst = arith.constant dense<0.000000e+00> : vector<8x128xf32>
    %7 = tpu.matmul %4, %6, %cst {dimension_numbers = #tpu.dot_dimension_numbers<[1], [0], [0], [1], [0, 0, 1, 1], [], []>} : vector<8x8xf32>, vector<8x128xf32>, vector<8x128xf32> -> vector<8x128xf32>
    %c1 = arith.constant 1 : index
    %c0_6 = arith.constant 0 : index
    %c0_7 = arith.constant 0 : index
    %8 = vector.load %arg1[%c1, %c0_6, %c0_7] : memref<4x8x8xf32, #tpu.memory_space<vmem>>, vector<1x8x8xf32>
    %9 = vector.shape_cast %8 : vector<1x8x8xf32> to vector<8x8xf32>
    %c1_8 = arith.constant 1 : index
    %c0_9 = arith.constant 0 : index
    %c0_10 = arith.constant 0 : index
    %10 = vector.load %arg2[%c1_8, %c0_9, %c0_10] : memref<4x8x128xf32, #tpu.memory_space<vmem>>, vector<1x8x128xf32>
    %11 = vector.shape_cast %10 : vector<1x8x128xf32> to vector<8x128xf32>
    %cst_11 = arith.constant dense<0.000000e+00> : vector<8x128xf32>
    %12 = tpu.matmul %9, %11, %cst_11 {dimension_numbers = #tpu.dot_dimension_numbers<[1], [0], [0], [1], [0, 0, 1, 1], [], []>} : vector<8x8xf32>, vector<8x128xf32>, vector<8x128xf32> -> vector<8x128xf32>
    %13 = arith.mulf %7, %12 : vector<8x128xf32>
    %14 = arith.addf %7, %12 : vector<8x128xf32>
    %c2 = arith.constant 2 : index
    %c0_12 = arith.constant 0 : index
    %c0_13 = arith.constant 0 : index
    %15 = vector.load %arg1[%c2, %c0_12, %c0_13] : memref<4x8x8xf32, #tpu.memory_space<vmem>>, vector<1x8x8xf32>
    %16 = vector.shape_cast %15 : vector<1x8x8xf32> to vector<8x8xf32>
    %c2_14 = arith.constant 2 : index
    %c0_15 = arith.constant 0 : index
    %c0_16 = arith.constant 0 : index
    %17 = vector.load %arg2[%c2_14, %c0_15, %c0_16] : memref<4x8x128xf32, #tpu.memory_space<vmem>>, vector<1x8x128xf32>
    %18 = vector.shape_cast %17 : vector<1x8x128xf32> to vector<8x128xf32>
    %cst_17 = arith.constant dense<0.000000e+00> : vector<8x128xf32>
    %19 = tpu.matmul %16, %18, %cst_17 {dimension_numbers = #tpu.dot_dimension_numbers<[1], [0], [0], [1], [0, 0, 1, 1], [], []>} : vector<8x8xf32>, vector<8x128xf32>, vector<8x128xf32> -> vector<8x128xf32>
    %20 = arith.mulf %13, %19 : vector<8x128xf32>
    %21 = arith.addf %14, %19 : vector<8x128xf32>
    %c3 = arith.constant 3 : index
    %c0_18 = arith.constant 0 : index
    %c0_19 = arith.constant 0 : index
    %22 = vector.load %arg1[%c3, %c0_18, %c0_19] : memref<4x8x8xf32, #tpu.memory_space<vmem>>, vector<1x8x8xf32>
    %23 = vector.shape_cast %22 : vector<1x8x8xf32> to vector<8x8xf32>
    %c3_20 = arith.constant 3 : index
    %c0_21 = arith.constant 0 : index
    %c0_22 = arith.constant 0 : index
    %24 = vector.load %arg2[%c3_20, %c0_21, %c0_22] : memref<4x8x128xf32, #tpu.memory_space<vmem>>, vector<1x8x128xf32>
    %25 = vector.shape_cast %24 : vector<1x8x128xf32> to vector<8x128xf32>
    %cst_23 = arith.constant dense<0.000000e+00> : vector<8x128xf32>
    %26 = tpu.matmul %23, %25, %cst_23 {dimension_numbers = #tpu.dot_dimension_numbers<[1], [0], [0], [1], [0, 0, 1, 1], [], []>} : vector<8x8xf32>, vector<8x128xf32>, vector<8x128xf32> -> vector<8x128xf32>
    %27 = arith.mulf %20, %26 : vector<8x128xf32>
    %28 = arith.addf %21, %26 : vector<8x128xf32>
    %cst_24 = arith.constant 1.000000e-30 : f32
    %cst_25 = arith.constant 1.000000e+30 : f32
    %29 = vector.broadcast %cst_24 : f32 to vector<8x128xf32>
    %30 = arith.maximumf %29, %27 : vector<8x128xf32>
    %31 = vector.broadcast %cst_25 : f32 to vector<8x128xf32>
    %32 = arith.minimumf %31, %30 : vector<8x128xf32>
    %33 = math.log %32 : vector<8x128xf32>
    %c0_26 = arith.constant 0 : index
    %34 = memref.load %arg5[%c0_26] : memref<1xf32, #tpu.memory_space<smem>>
    %c0_27 = arith.constant 0 : index
    %c0_28 = arith.constant 0 : index
    %35 = vector.load %arg3[%c0_27, %c0_28] : memref<8x128xf32, #tpu.memory_space<vmem>>, vector<8x128xf32>
    %36 = arith.mulf %35, %33 : vector<8x128xf32>
    %c0_29 = arith.constant 0 : index
    %c0_30 = arith.constant 0 : index
    %37 = vector.load %arg4[%c0_29, %c0_30] : memref<8x128xf32, #tpu.memory_space<vmem>>, vector<8x128xf32>
    %38 = arith.mulf %37, %28 : vector<8x128xf32>
    %39 = arith.subf %36, %38 : vector<8x128xf32>
    %40 = vector.shape_cast %39 : vector<8x128xf32> to vector<1x8x128xf32>
    %cst_31 = arith.constant dense<0.000000e+00> : vector<1xf32>
    %41 = vector.multi_reduction <add>, %40, %cst_31 [1, 2] : vector<1x8x128xf32> to vector<1xf32>
    %42 = vector.shape_cast %41 : vector<1xf32> to vector<1x1x1xf32>
    %43 = vector.extract %42[0, 0, 0] : f32 from vector<1x1x1xf32>
    %44 = arith.addf %34, %43 : f32
    %c0_32 = arith.constant 0 : index
    %45 = memref.load %arg5[%c0_32] : memref<1xf32, #tpu.memory_space<smem>>
    memref.store %44, %arg5[%c0_32] : memref<1xf32, #tpu.memory_space<smem>>
    return
  }
  func.func @transform_0(%arg0: i32) -> (i32, i32, i32) {
    %c0_i32 = arith.constant 0 : i32
    %c0_i32_0 = arith.constant 0 : i32
    %c0_i32_1 = arith.constant 0 : i32
    %c0_i32_2 = arith.constant 0 : i32
    return %c0_i32, %c0_i32_0, %c0_i32_1 : i32, i32, i32
  }
  func.func @transform_1(%arg0: i32) -> (i32, i32, i32) {
    %c0_i32 = arith.constant 0 : i32
    %c0_i32_0 = arith.constant 0 : i32
    %c0_i32_1 = arith.constant 0 : i32
    return %c0_i32, %c0_i32_0, %arg0 : i32, i32, i32
  }
  func.func @transform_2(%arg0: i32) -> (i32, i32) {
    %c0_i32 = arith.constant 0 : i32
    %c0_i32_0 = arith.constant 0 : i32
    return %c0_i32, %arg0 : i32, i32
  }
  func.func @transform_3(%arg0: i32) -> (i32, i32) {
    %c0_i32 = arith.constant 0 : i32
    %c0_i32_0 = arith.constant 0 : i32
    return %c0_i32, %arg0 : i32, i32
  }
  func.func @transform_4(%arg0: i32) -> i32 {
    %c0_i32 = arith.constant 0 : i32
    %c0_i32_0 = arith.constant 0 : i32
    return %c0_i32 : i32
  }
}

module attributes {stable_mosaic.version = 11 : i64} {
  func.func @_prior_entropy_kernel(%arg0: i32, %arg1: i32, %arg2: memref<1x8x128xf32, #tpu.memory_space<vmem>>, %arg3: memref<8x128xf32, #tpu.memory_space<vmem>>, %arg4: memref<8x128xf32, #tpu.memory_space<vmem>>, %arg5: memref<8x128xf32, #tpu.memory_space<vmem>>, %arg6: memref<2xf32, #tpu.memory_space<smem>>, %arg7: memref<8x128xf32, #tpu.memory_space<vmem>>, %arg8: memref<8x128xf32, #tpu.memory_space<vmem>>) attributes {dimension_semantics = [#tpu.dimension_semantics<arbitrary>, #tpu.dimension_semantics<arbitrary>], iteration_bounds = array<i64: 1, 4>, scalar_prefetch = 0 : i64, scratch_operands = 2 : i64, tpu.core_type = #tpu.core_type<tc>, window_params = [{transform_indices = @transform_0, window_bounds = array<i64: 1, 8, 128>}, {transform_indices = @transform_1, window_bounds = array<i64: 8, 128>}, {transform_indices = @transform_2, window_bounds = array<i64: 8, 128>}, {transform_indices = @transform_3, window_bounds = array<i64: 8, 128>}, {transform_indices = @transform_4, window_bounds = array<i64: 2>}]} {
    %c0_i32 = arith.constant 0 : i32
    %0 = arith.cmpi eq, %arg0, %c0_i32 : i32
    %c0_i32_0 = arith.constant 0 : i32
    %1 = arith.cmpi eq, %arg1, %c0_i32_0 : i32
    %2 = arith.andi %0, %1 : i1
    %3 = arith.extui %2 : i1 to i32
    %c0_i32_1 = arith.constant 0 : i32
    %4 = arith.cmpi ne, %3, %c0_i32_1 : i32
    scf.if %4 {
      %cst_20 = arith.constant 0.000000e+00 : f32
      %30 = vector.broadcast %cst_20 : f32 to vector<8x128xf32>
      %c0_21 = arith.constant 0 : index
      %c0_22 = arith.constant 0 : index
      %31 = vector.load %arg7[%c0_21, %c0_22] : memref<8x128xf32, #tpu.memory_space<vmem>>, vector<8x128xf32>
      tpu.vector_store %arg7[%c0_21, %c0_22], %30 {strides = array<i32>} : memref<8x128xf32, #tpu.memory_space<vmem>>, vector<8x128xf32>,
      %cst_23 = arith.constant 0.000000e+00 : f32
      %32 = vector.broadcast %cst_23 : f32 to vector<8x128xf32>
      %c0_24 = arith.constant 0 : index
      %c0_25 = arith.constant 0 : index
      %33 = vector.load %arg8[%c0_24, %c0_25] : memref<8x128xf32, #tpu.memory_space<vmem>>, vector<8x128xf32>
      tpu.vector_store %arg8[%c0_24, %c0_25], %32 {strides = array<i32>} : memref<8x128xf32, #tpu.memory_space<vmem>>, vector<8x128xf32>,
    } else {
    }
    %c0 = arith.constant 0 : index
    %c0_2 = arith.constant 0 : index
    %c0_3 = arith.constant 0 : index
    %5 = vector.load %arg2[%c0, %c0_2, %c0_3] : memref<1x8x128xf32, #tpu.memory_space<vmem>>, vector<1x8x128xf32>
    %6 = vector.shape_cast %5 : vector<1x8x128xf32> to vector<8x128xf32>
    %7 = math.log %6 : vector<8x128xf32>
    %c0_4 = arith.constant 0 : index
    %c0_5 = arith.constant 0 : index
    %8 = vector.load %arg7[%c0_4, %c0_5] : memref<8x128xf32, #tpu.memory_space<vmem>>, vector<8x128xf32>
    %cst = arith.constant -0.899999976 : f32
    %9 = vector.broadcast %cst : f32 to vector<8x128xf32>
    %10 = arith.mulf %9, %7 : vector<8x128xf32>
    %c0_6 = arith.constant 0 : index
    %c0_7 = arith.constant 0 : index
    %11 = vector.load %arg3[%c0_6, %c0_7] : memref<8x128xf32, #tpu.memory_space<vmem>>, vector<8x128xf32>
    %12 = arith.mulf %11, %6 : vector<8x128xf32>
    %13 = arith.subf %10, %12 : vector<8x128xf32>
    %14 = arith.addf %8, %13 : vector<8x128xf32>
    %c0_8 = arith.constant 0 : index
    %c0_9 = arith.constant 0 : index
    %15 = vector.load %arg7[%c0_8, %c0_9] : memref<8x128xf32, #tpu.memory_space<vmem>>, vector<8x128xf32>
    tpu.vector_store %arg7[%c0_8, %c0_9], %14 {strides = array<i32>} : memref<8x128xf32, #tpu.memory_space<vmem>>, vector<8x128xf32>,
    %c0_10 = arith.constant 0 : index
    %c0_11 = arith.constant 0 : index
    %16 = vector.load %arg4[%c0_10, %c0_11] : memref<8x128xf32, #tpu.memory_space<vmem>>, vector<8x128xf32>
    %17 = arith.subf %7, %16 : vector<8x128xf32>
    %c0_12 = arith.constant 0 : index
    %c0_13 = arith.constant 0 : index
    %18 = vector.load %arg5[%c0_12, %c0_13] : memref<8x128xf32, #tpu.memory_space<vmem>>, vector<8x128xf32>
    %19 = arith.mulf %17, %18 : vector<8x128xf32>
    %c0_14 = arith.constant 0 : index
    %c0_15 = arith.constant 0 : index
    %20 = vector.load %arg8[%c0_14, %c0_15] : memref<8x128xf32, #tpu.memory_space<vmem>>, vector<8x128xf32>
    %21 = arith.mulf %19, %19 : vector<8x128xf32>
    %22 = arith.addf %21, %7 : vector<8x128xf32>
    %23 = arith.addf %20, %22 : vector<8x128xf32>
    %c0_16 = arith.constant 0 : index
    %c0_17 = arith.constant 0 : index
    %24 = vector.load %arg8[%c0_16, %c0_17] : memref<8x128xf32, #tpu.memory_space<vmem>>, vector<8x128xf32>
    tpu.vector_store %arg8[%c0_16, %c0_17], %23 {strides = array<i32>} : memref<8x128xf32, #tpu.memory_space<vmem>>, vector<8x128xf32>,
    %c0_i32_18 = arith.constant 0 : i32
    %25 = arith.cmpi eq, %arg0, %c0_i32_18 : i32
    %c3_i32 = arith.constant 3 : i32
    %26 = arith.cmpi eq, %arg1, %c3_i32 : i32
    %27 = arith.andi %25, %26 : i1
    %28 = arith.extui %27 : i1 to i32
    %c0_i32_19 = arith.constant 0 : i32
    %29 = arith.cmpi ne, %28, %c0_i32_19 : i32
    scf.if %29 {
      %c0_20 = arith.constant 0 : index
      %c0_21 = arith.constant 0 : index
      %30 = vector.load %arg7[%c0_20, %c0_21] : memref<8x128xf32, #tpu.memory_space<vmem>>, vector<8x128xf32>
      %31 = vector.shape_cast %30 : vector<8x128xf32> to vector<1x8x128xf32>
      %cst_22 = arith.constant dense<0.000000e+00> : vector<1xf32>
      %32 = vector.multi_reduction <add>, %31, %cst_22 [1, 2] : vector<1x8x128xf32> to vector<1xf32>
      %33 = vector.shape_cast %32 : vector<1xf32> to vector<1x1x1xf32>
      %34 = vector.extract %33[0, 0, 0] : f32 from vector<1x1x1xf32>
      %c0_23 = arith.constant 0 : index
      %35 = memref.load %arg6[%c0_23] : memref<2xf32, #tpu.memory_space<smem>>
      memref.store %34, %arg6[%c0_23] : memref<2xf32, #tpu.memory_space<smem>>
      %c0_24 = arith.constant 0 : index
      %c0_25 = arith.constant 0 : index
      %36 = vector.load %arg8[%c0_24, %c0_25] : memref<8x128xf32, #tpu.memory_space<vmem>>, vector<8x128xf32>
      %37 = vector.shape_cast %36 : vector<8x128xf32> to vector<1x8x128xf32>
      %cst_26 = arith.constant dense<0.000000e+00> : vector<1xf32>
      %38 = vector.multi_reduction <add>, %37, %cst_26 [1, 2] : vector<1x8x128xf32> to vector<1xf32>
      %39 = vector.shape_cast %38 : vector<1xf32> to vector<1x1x1xf32>
      %40 = vector.extract %39[0, 0, 0] : f32 from vector<1x1x1xf32>
      %c1 = arith.constant 1 : index
      %41 = memref.load %arg6[%c1] : memref<2xf32, #tpu.memory_space<smem>>
      memref.store %40, %arg6[%c1] : memref<2xf32, #tpu.memory_space<smem>>
    } else {
    }
    return
  }
  func.func @transform_0(%arg0: i32, %arg1: i32) -> (i32, i32, i32) {
    %c0_i32 = arith.constant 0 : i32
    %c0_i32_0 = arith.constant 0 : i32
    return %arg1, %arg0, %c0_i32 : i32, i32, i32
  }
  func.func @transform_1(%arg0: i32, %arg1: i32) -> (i32, i32) {
    %c0_i32 = arith.constant 0 : i32
    %c0_i32_0 = arith.constant 0 : i32
    return %arg0, %c0_i32 : i32, i32
  }
  func.func @transform_2(%arg0: i32, %arg1: i32) -> (i32, i32) {
    %c0_i32 = arith.constant 0 : i32
    %c0_i32_0 = arith.constant 0 : i32
    return %arg0, %c0_i32 : i32, i32
  }
  func.func @transform_3(%arg0: i32, %arg1: i32) -> (i32, i32) {
    %c0_i32 = arith.constant 0 : i32
    %c0_i32_0 = arith.constant 0 : i32
    return %arg0, %c0_i32 : i32, i32
  }
  func.func @transform_4(%arg0: i32, %arg1: i32) -> i32 {
    %c0_i32 = arith.constant 0 : i32
    %c0_i32_0 = arith.constant 0 : i32
    return %c0_i32 : i32
  }
}

</mosaic_0001>

<bundles_post_ra>
// kernel: _forward_impl.4
= control target key start
LH: loop header
LB: loop body
LE: loop exit
PB: predicated region body
PF: predicated region fallthrough
CT: control target
= control target key end

     0   :  { %vm26_vm0 = vcmask 64512   ;;  %v430_v3 = vmov 0.0   ;;  %vm431_vm1 = vmmov 0   ;;  %s508_s0 = inlined_call_operand.vmem [shape: f32[4,8,8], index: 0, kind: input, shape index: {}]   ;;  %s509_s1 = inlined_call_operand.vmem [shape: f32[4,8,128], index: 1, kind: input, shape index: {}]   ;;  %s510_s2 = inlined_call_operand.vmem [shape: f32[8,128], index: 2, kind: input, shape index: {}]   ;;  %s511_s3 = inlined_call_operand.vmem [shape: f32[8,128], index: 3, kind: input, shape index: {}]   ;;  %s512_s4 = inlined_call_operand.hbm [shape: f32[1], index: 4, kind: output, shape index: {}]  }
   0x1   :  { %v25_v0 = vld [vmem:[%s509_s1] sm:$0xff]  ;;  %v374_v2 = vld [vmem:[%s509_s1 + $0x8] sm:$0xff]  ;;  %390 = vmatprep.subr.mxu0 %v430_v3  ;;  %392 = vmatprep.mubr.msk.f32.mxu0 %vm431_vm1, %v430_v3  ;;  %v377_v5 = vld [vmem:[%s509_s1 + $0x10] sm:$0xff] }
   0x2   :  { %v24_v1 = vld [vmem:[%s508_s0] sm:$0xff]  ;;  %391 = vmatpush3.msra.mxu0 %v25_v0  ;;  %395 = vmatprep.subr.mxu1 %v430_v3  ;;  %v373_v4 = vld [vmem:[%s508_s0 + $0x8] sm:$0xff] }
   0x3   :  { %9 = vsyncpa [#allocation3], 0  ;;  %393 = vmatmul.mubr.msk.f32.vlgmr.msra.gmra.mrb[0].mxu0 %vm26_vm0, %v24_v1  ;;  %396 = vmatpush3.msra.mxu1 %v374_v2  ;;  %v380_v6 = vld [vmem:[%s509_s1 + $0x18] sm:$0xff]  ;;  %v376_v7 = vld [vmem:[%s508_s0 + $0x10] sm:$0xff]  ;;  %s418_s9 = scalar_lea.hbm %s512_s4, 16 }
   0x4   :  { %397 = vmatprep.mubr.msk.f32.mxu1 %vm431_vm1, %v430_v3  ;;  %400 = vmatprep.subr.mxu0 %v430_v3  ;;  %v379_v8 = vld [vmem:[%s508_s0 + $0x18] sm:$0xff]  ;;  %v342_v26 = vld [vmem:[%s510_s2] sm:$0xff]  ;;  %p419_p0 = scmp.ne.s32.totalorder %s512_s4, %s418_s9  ;;  %p422_p1 = scmp.lt.u32.totalorder %s418_s9, %s512_s4 }
   0x5   :  { %398 = vmatmul.mubr.msk.f32.vlgmr.msra.gmra.mrb[0].mxu1 %vm26_vm0, %v373_v4  ;;  %401 = vmatpush3.msra.mxu0 %v377_v5  ;;  %v344_v27 = vld [vmem:[%s511_s3] sm:$0xff] }
   0x6   :  { %405 = vmatprep.subr.mxu1 %v430_v3  ;;  %402 = vmatprep.mubr.msk.f32.mxu0 %vm431_vm1, %v430_v3  ;;  %p424_p2 = pnand %p422_p1, %p419_p0 }
   0x7   :  { %406 = vmatpush3.msra.mxu1 %v380_v6  ;;  %403 = vmatmul.mubr.msk.f32.vlgmr.msra.gmra.mrb[2].mxu0 %vm26_vm0, %v376_v7 }
   0x8   :  { %407 = vmatprep.mubr.msk.f32.mxu1 %vm431_vm1, %v430_v3 }
   0x9   :  { %408 = vmatmul.mubr.msk.f32.vlgmr.msra.gmra.mrb[2].mxu1 %vm26_vm0, %v379_v8 }
  0xd6   :  { %v96_v9 = vpop.f32.mrb[0].mxu0 }
  0xd7   :  { %v394_v10 = vpop.f32.mrb[1].mxu0 }
  0xd8   :  { %v173_v11 = vpop.f32.mrb[0].mxu1 }
  0xd9   :  { %v177_v12 = vmul.f32 %v173_v11, %v96_v9  ;;  %v178_v13 = vadd.f32 %v173_v11, %v96_v9  ;;  %v399_v14 = vpop.f32.mrb[1].mxu1 }
  0xda   :  { %v252_v15 = vpop.f32.mrb[2].mxu0 }
  0xdb   :  { %v256_v16 = vmul.f32 %v252_v15, %v177_v12  ;;  %v257_v17 = vadd.f32 %v252_v15, %v178_v13  ;;  %v404_v18 = vpop.f32.mrb[3].mxu0 }
  0xdc   :  { %v331_v19 = vpop.f32.mrb[2].mxu1 }
  0xdd   :  { %v335_v20 = vmul.f32 %v331_v19, %v256_v16  ;;  %v336_v21 = vadd.f32 %v331_v19, %v257_v17  ;;  %v409_v22 = vpop.f32.mrb[3].mxu1 }
  0xdf   :  { %v337_v23 = vmax.f32 %v335_v20, 1e-30  ;;  %v345_v30 = vmul.f32 %v344_v27, %v336_v21 }
  0xe1   :  { %v338_v24 = vmin.f32 %v337_v23, 1e+30 }
  0xe3   :  { %416 = vlog2.f32 %v338_v24 }
  0xed   :  { %v417_v25 = vpop.eup %416 }
  0xee   :  { %v340_v28 = vmul.f32 0.6931472, %v417_v25 }
  0xf0   :  { %v343_v29 = vmul.f32 %v342_v26, %v340_v28 }
  0xf2   :  { %v346_v31 = vsub.f32 %v343_v29, %v345_v30 }
  0xf4   :  { %347 = vadd.xlane.f32.xlu0 %v346_v31 }
 0x181   :  { %v348_v32 = vpop.xlane.xlu0 %347 }
 0x182   :  { %v349_v33 = vrot.slane %v348_v32, 4 }
 0x184   :  { %v350_v34 = vadd.f32 %v349_v33, %v348_v32 }
 0x186   :  { %v351_v35 = vrot.slane %v350_v34, 2 }
 0x188   :  { %v352_v36 = vadd.f32 %v351_v35, %v350_v34 }
 0x18a   :  { %v353_v37 = vrot.slane %v352_v36, 1 }
 0x18c   :  { %v354_v38 = vadd.f32 %v353_v37, %v352_v36 }
 0x18e   :  { %410 = vpush %v354_v38 }
 0x1bf   :  { %s411_s7 = spop %410 }
 0x1c0   :  { %358 = sst [smem:[#allocation2]] %s411_s7 }
 0x1c1   :  { %427 = shalt.err (!%p424_p2)
}
 0x1c2   :  { %s432_s13 = smov [#allocation2]  }
 0x1c3   :  { %366 = dma.smem_to_hbm %s432_s13, 16, %s512_s4, [#allocation3]  }
 0x1c4   :  { %428 = dma.done.wait [#allocation3], 16  }
 0x1c5   :  { %429 = vsyncadd [#allocation3], 4294967280 }
 0x1c6   :  { %370 = sfence }
 0x1c7   :  { %371 = vsyncpa [#allocation3], 1 }

// kernel: _forward_impl.5
= control target key start
LH: loop header
LB: loop body
LE: loop exit
PB: predicated region body
PF: predicated region fallthrough
CT: control target
= control target key end

     0   :  { %9 = vsyncpa [#allocation5], 0  ;;  %s538_s15 = smov 0   ;;  %s540_s16 = smov 0   ;;  %s603_s0 = inlined_call_operand.vmem [shape: f32[4,8,128], index: 0, kind: input, shape index: {}]   ;;  %s604_s1 = inlined_call_operand.vmem [shape: f32[8,128], index: 1, kind: input, shape index: {}]   ;;  %s605_s2 = inlined_call_operand.vmem [shape: f32[8,128], index: 2, kind: input, shape index: {}]   ;;  %s606_s3 = inlined_call_operand.vmem [shape: f32[8,128], index: 3, kind: input, shape index: {}]   ;;  %s607_s4 = inlined_call_operand.vmem [shape: f32[2], index: 4, kind: output, shape index: {}]  }
   0x1   :  { %s542_s17 = smov 0  }
   0x2 LB: > { %s415_s18 = sadd.s32 4294967295, %s509_s17   ;;  %s24_s19 = sadd.s32 1, %s505_s16  ;;  %s509_s17 = sphi %s542_s17, %s15_s17   ;;  %s505_s16 = sphi %s540_s16, %s610_s16   ;;  %s501_s15 = sphi %s538_s15, %s609_s15  }
   0x3   : > { %p25_p0 = scmp.ge.s32.totalorder %s24_s19, 4  ;;  %p421_p1 = scmp.ge.s32.totalorder %s509_s17, 1 }
   0x4   : > { %p201_p2 = scmp.lt.s32.totalorder %s509_s17, 5 }
   0x5   : > { %s612_s19 = smov (%p25_p0, %s24_s19), 0 }
   0x6   : > { %p202_p3 = pnand %p421_p1, %p201_p2 }
   0x7   : > { %p236_p4 = scmp.lt.s32.totalorder (!%p202_p3), %s501_s15, 3  ;;  %p256_p5 = scmp.eq.s32.totalorder (!%p202_p3), %s501_s15, 0 }
   0x8   : > { %205 = sbr.rel (%p202_p3) target bundleno = 276 (0x114), region = 36 }
   0xf   : > { %s237_s20 = scalar_select %p236_p4, %s501_s15, 3 }
  0x10   : > { %260 = sbr.rel (!%p256_p5) target bundleno = 23 (0x17), region = 40  ;;  %v511_v0 = vmov (%p256_p5), 0.0  }
  0x11   : > { %s422_s21 = sshll.u32 %s237_s20, 3  ;;  %261 = vst [vmem:[#allocation2] sm:$0xff] (%p256_p5), %v511_v0  ;;  %262 = vst [vmem:[#allocation3] sm:$0xff] (%p256_p5), %v511_v0 }
  0x12   : > { %s242_s24 = scalar_lea.vmem %s603_s0, %s422_s21 }
  0x17 PF: > { %v263_v1 = vld [vmem:[%s242_s24] sm:$0xff]  ;;  %p282_p6 = scmp.eq.s32.totalorder %s501_s15, 3 }
  0x18   : > { %467 = vlog2.f32 %v263_v1  ;;  %v268_v2 = vld [vmem:[%s604_s1] sm:$0xff]  ;;  %v277_v15 = vld [vmem:[#allocation3] sm:$0xff] }
  0x19   : > { %v273_v4 = vld [vmem:[%s605_s2] sm:$0xff]  ;;  %v269_v6 = vmul.f32 %v268_v2, %v263_v1 }
  0x1a   : > { %v275_v7 = vld [vmem:[%s606_s3] sm:$0xff] }
  0x1b   : > { %v266_v10 = vld [vmem:[#allocation2] sm:$0xff] }
  0x22   : > { %v468_v3 = vpop.eup %467 }
  0x23   : > { %v265_v5 = vmul.f32 0.6931472, %v468_v3 }
  0x25   : > { %v267_v8 = vmul.f32 -0.9, %v265_v5  ;;  %v274_v9 = vsub.f32 %v265_v5, %v273_v4 }
  0x27   : > { %v270_v11 = vsub.f32 %v267_v8, %v269_v6  ;;  %v276_v12 = vmul.f32 %v275_v7, %v274_v9 }
  0x29   : > { %v271_v13 = vadd.f32 %v270_v11, %v266_v10  ;;  %v278_v14 = vmul.f32 %v276_v12, %v276_v12  ;;  %286 = sbr.rel (!%p282_p6) target bundleno = 260 (0x104), region = 44 }
  0x2b   : > { %272 = vst [vmem:[#allocation2] sm:$0xff] %v271_v13  ;;  %v279_v16 = vadd.f32 %v278_v14, %v265_v5 }
  0x2d   : > { %v280_v17 = vadd.f32 %v279_v16, %v277_v15 }
  0x2f   : > { %281 = vst [vmem:[#allocation3] sm:$0xff] %v280_v17 }
  0x32   : > { %v287_v18 = vld [vmem:[#allocation2] sm:$0xff] }
  0x33   : > { %288 = vadd.xlane.f32.xlu0 %v287_v18 }
  0x36   : > { %v299_v19 = vld [vmem:[#allocation3] sm:$0xff] }
  0x37   : > { %300 = vadd.xlane.f32.xlu0 %v299_v19 }
  0xc0   : > { %v289_v20 = vpop.xlane.xlu0 %288 }
  0xc1   : > { %v290_v21 = vrot.slane %v289_v20, 4 }
  0xc3   : > { %v291_v22 = vadd.f32 %v290_v21, %v289_v20 }
  0xc4   : > { %v301_v23 = vpop.xlane.xlu0 %300 }
  0xc5   : > { %v292_v24 = vrot.slane %v291_v22, 2  ;;  %v302_v25 = vrot.slane %v301_v23, 4 }
  0xc7   : > { %v303_v26 = vadd.f32 %v302_v25, %v301_v23  ;;  %v293_v27 = vadd.f32 %v292_v24, %v291_v22 }
  0xc9   : > { %v304_v28 = vrot.slane %v303_v26, 2  ;;  %v294_v29 = vrot.slane %v293_v27, 1 }
  0xcb   : > { %v305_v30 = vadd.f32 %v304_v28, %v303_v26  ;;  %v295_v31 = vadd.f32 %v294_v29, %v293_v27 }
  0xcd   : > { %431 = vpush %v295_v31  ;;  %v306_v32 = vrot.slane %v305_v30, 1 }
  0xcf   : > { %v307_v33 = vadd.f32 %v306_v32, %v305_v30 }
  0xd1   : > { %433 = vpush %v307_v33 }
  0xfe   : > { %s432_s5 = spop %431 }
  0xff   : > { %298 = sst [smem:[#allocation4]] %s432_s5 }
 0x102   : > { %s434_s6 = spop %433 }
 0x103   : > { %310 = sst [smem:[#allocation4 + $0x1]] %s434_s6 }
 0x104 PF: > { %p579_p7 = scmp.eq.s32.totalorder %s415_s18, 3  ;;  %s318_s10 = sshll.u32 %s607_s4, 4  ;;  %s319_s10 = int_to_ptr.vmem [resolvable:$true] %s318_s10 }
 0x105   : > { %s469_s11 = scalar_lea.vmem %s319_s10, 16  ;;  %p476_p11 = scmp.lt.s32.totalorder %s319_s10, %s319_s10 }
 0x106   : > { %p470_p8 = scmp.ne.s32.totalorder %s319_s10, %s469_s11  ;;  %p477_p12 = scmp.lt.s32.totalorder %s469_s11, %s469_s11 }
 0x108   : > { %p471_p9 = pnand %p470_p8, %p579_p7  ;;  %p478_p13 = por %p477_p12, %p476_p11 }
 0x10a   : > { %p472_p10 = pneg %p471_p9 }
 0x10c   : > { %p479_p0 = pnand %p478_p13, %p472_p10 }
 0x10e   : > { %482 = shalt.err (!%p479_p0)
}
 0x10f   : > { %s512_s12 = smov [#allocation4]  }
 0x110   : > { %436 = dma.smem_to_vmem (%p579_p7), %s512_s12, 16, %s319_s10, [#allocation5]  }
 0x111   : > { %496 = dma.done.wait (%p579_p7), [#allocation5], 16  }
 0x112   : > { %498 = vsyncadd (%p579_p7), [#allocation5], 4294967280 }
 0x113   : > { %326 = sfence }
 0x114 PF: > { %s15_s17 = sadd.s32 1, %s509_s17   ;;  %s609_s15 = smov %s505_s16 }
 0x115   : > { %p12_p1 = scmp.ge.s32.totalorder %s15_s17, 6   ;;  %s610_s16 = smov %s612_s19 }
 0x117   :  { %14 = sbr.rel (!%p12_p1) target bundleno = 2 (0x2), region = 82 }
 0x11e   :  { %332 = vsyncpa [#allocation5], 1 }
 0x11f   :  { %334 = vsyncpa [#allocation5 + $0x1], 1 }

</bundles_post_ra>
